<compile_context>
chip_gen: v6e
topology: v6e:2x2x1
jax: 0.10.0
libtpu: 0.0.40
codegen_flags: <defaults>
</compile_context>

<pallas_src>
import functools

import jax
import jax.numpy as jnp
from jax.experimental import pallas as pl
from jax.experimental.pallas import tpu as pltpu


def _round_up(x, m):
    return ((x + m - 1) // m) * m


def _pick_tile(total, max_tile, step):
    """Largest multiple of `step` that is <= max_tile (and <= total) and divides total.

    `total` must be a multiple of `step`, so `step` is always a valid fallback.
    """
    t = min(total, max(step, (max_tile // step) * step))
    while total % t:
        t -= step
    return t


# ----------------------------------------------------------------------------- kernel


def stat_embed_kernel(code_ref, w_ref, b_ref, out_ref, acc_ref):
    # code_ref: (TB, TK)   w_ref: (TK, TL)   b_ref: (1, TL)   out_ref: (TB, TL)
    # acc_ref:  (TB, TL) f32 VMEM scratch, persists across the K ("arbitrary") axis.
    k = pl.program_id(2)

    @pl.when(k == 0)
    def _():
        acc_ref[...] = jnp.zeros_like(acc_ref)

    a = code_ref[...]
    w = w_ref[...]
    if a.dtype != w.dtype:  # optional bf16 weight path (static at trace time)
        a = a.astype(w.dtype)
    acc_ref[...] += jnp.dot(a, w, preferred_element_type=jnp.float32)

    @pl.when(k == pl.num_programs(2) - 1)
    def _():
        out_ref[...] = (acc_ref[...] + b_ref[...]).astype(out_ref.dtype)


# -------------------------------------------------------------- one-time param prep


def prepare_stat_embed_params(embed_w, fc_w, fc_b, *, max_l_tile=512, max_k_tile=512,
                              weights_dtype=jnp.float32):
    """One-time parameter fold + padding. Call at init time, NOT per forward call.

        w_fold[v, l] = sum_e embed_w[v, e] * fc_w[l, v*E + e]
    so   code @ w_fold + fc_b   reproduces the PyTorch forward (up to f32 rounding).
    """
    V, E = embed_w.shape
    L = fc_b.shape[0]
    assert fc_w.shape == (L, V * E)

    # W3[v, e, l] == fc_w[l, v*E + e] (matches PyTorch flatten order), then fold over e.
    w3 = jnp.transpose(fc_w.astype(jnp.float32), (1, 0)).reshape(V, E, L)
    w_fold = jnp.einsum("ve,vel->vl", embed_w.astype(jnp.float32), w3)  # (V, L)

    # Lane-dense output: pad L to a 128-multiple; tile_l is a 128-multiple DIVISOR of it.
    l_pad = _round_up(L, 128)
    tile_l = _pick_tile(l_pad, max_l_tile, 128)

    # Reduction (V) axis: single full-dim K step when small, else 128-multiple K tiles.
    if V <= max_k_tile:
        v_pad, tile_k = V, V
    else:
        v_pad = _round_up(V, 128)
        tile_k = _pick_tile(v_pad, max_k_tile, 128)

    w_pad = (jnp.zeros((v_pad, l_pad), jnp.float32).at[:V, :L].set(w_fold)
             ).astype(weights_dtype)
    b_pad = jnp.zeros((1, l_pad), jnp.float32).at[0, :L].set(fc_b.astype(jnp.float32))

    return dict(w_pad=w_pad, b_pad=b_pad, tile_l=tile_l, tile_k=tile_k,
                latent_size=L, vocab_size=V)


# ------------------------------------------------------------------------- forward


def stat_embed_forward_pallas(code, params, *, max_b_tile=256):
    """code: (B, V) any real dtype; params from prepare_stat_embed_params()."""
    B, V = code.shape
    w_pad, b_pad = params["w_pad"], params["b_pad"]
    tile_l, tile_k = params["tile_l"], params["tile_k"]
    L = params["latent_size"]
    assert params["vocab_size"] == V
    v_pad, l_pad = w_pad.shape

    code_f = code.astype(jnp.float32)

    # Batch tiling: full-dim single block when B is small & ragged (no per-call pad op),
    # else pad to a multiple of 8 and pick a divisor tile.
    if B % 8 == 0 or B <= max_b_tile:
        b_padded = B
    else:
        b_padded = _round_up(B, 8)
    tile_b = _pick_tile(b_padded, max_b_tile, 8) if b_padded % 8 == 0 else b_padded
    if b_padded != B:
        code_f = jnp.zeros((b_padded, V), jnp.float32).at[:B, :].set(code_f)
    if v_pad != V:  # only when the vocab axis is K-tiled
        code_f = jnp.zeros((b_padded, v_pad), jnp.float32).at[:, :V].set(code_f)

    # Grid order (review): L outermost, B inner "parallel", K innermost "arbitrary".
    grid = (l_pad // tile_l, b_padded // tile_b, v_pad // tile_k)

    # VMEM budget: double-buffered inputs + output, plus the f32 accumulator.
    vmem_bytes = 4 * (2 * (tile_b * tile_k + tile_k * tile_l + tile_l)
                      + 2 * tile_b * tile_l + tile_b * tile_l)
    vmem_limit = int(min(max(2 * vmem_bytes, 4 << 20), 64 << 20))

    out = pl.pallas_call(
        stat_embed_kernel,
        out_shape=jax.ShapeDtypeStruct((b_padded, l_pad), jnp.float32),
        grid_spec=pltpu.PrefetchScalarGridSpec(
            num_scalar_prefetch=0,
            grid=grid,
            in_specs=[
                pl.BlockSpec((tile_b, tile_k), lambda j, i, k: (i, k)),  # code rows
                pl.BlockSpec((tile_k, tile_l), lambda j, i, k: (k, j)),  # folded weight
                pl.BlockSpec((1, tile_l), lambda j, i, k: (0, j)),       # bias
            ],
            out_specs=pl.BlockSpec((tile_b, tile_l), lambda j, i, k: (i, j)),
            scratch_shapes=[pltpu.VMEM((tile_b, tile_l), jnp.float32)],
        ),
        compiler_params=pltpu.CompilerParams(
            dimension_semantics=("parallel", "parallel", "arbitrary"),
            vmem_limit_bytes=vmem_limit,
        ),
    )(code_f, w_pad, b_pad)

    return out[:B, :L]


def stat_embed_apply(code, params, *, min_pallas_flops=1 << 22):
    """Dispatch: at tiny shapes the pallas_call fixed cost dominates — use plain XLA."""
    B, V = code.shape
    L = params["latent_size"]
    if 2 * B * V * L < min_pallas_flops:
        w = params["w_pad"][:V, :L].astype(jnp.float32)
        return code.astype(jnp.float32) @ w + params["b_pad"][0, :L]
    return stat_embed_forward_pallas(code, params)


# ------------------------------------------------------------------------ reference


def stat_embed_reference(code, embed_w, fc_w, fc_b):
    """Pure-JAX reference mirroring the PyTorch forward exactly."""
    B, V = code.shape
    code_f = code.astype(jnp.float32)
    scaled = code_f[:, :, None] * embed_w[None, :, :]          # (B, V, E)
    flat = scaled.reshape(B, -1)                               # (B, V*E)
    return flat @ fc_w.T + fc_b                                # (B, L)


if __name__ == "__main__":
    # Small shapes consistent with the module:
    #   batch B=2, code_vocab_size V=8, embed_size E=16, latent_size L=32
    B, V, E, L = 2, 8, 16, 32

    key = jax.random.PRNGKey(0)
    k_code, k_emb, k_w, k_b = jax.random.split(key, 4)

    embed_w = jax.random.normal(k_emb, (V, E), dtype=jnp.float32) * 0.1   # Embedding weight
    fc_w = jax.random.normal(k_w, (L, E * V), dtype=jnp.float32) * 0.05   # Linear weight (out, in)
    fc_b = jax.random.normal(k_b, (L,), dtype=jnp.float32) * 0.01         # Linear bias

    # Input multi-hot / count vector per sample, shape (B, V).
    code = jax.random.uniform(k_code, (B, V), dtype=jnp.float32)

    # One-time parameter fold (init-time work, hoisted out of the forward path).
    params = prepare_stat_embed_params(embed_w, fc_w, fc_b)

    # Exercise the Pallas path explicitly (the dispatcher would route these tiny shapes
    # to plain XLA in production).
    out = stat_embed_forward_pallas(code, params)
    out = jax.block_until_ready(out)

    ref = stat_embed_reference(code, embed_w, fc_w, fc_b)
    assert out.shape == (B, L) and out.dtype == jnp.float32
    assert jnp.allclose(out, ref, atol=1e-5, rtol=1e-5), "pallas path mismatch vs reference"

    # Sanity-check the dispatcher path as well.
    out2 = jax.block_until_ready(stat_embed_apply(code, params))
    assert jnp.allclose(out2, ref, atol=1e-5, rtol=1e-5), "dispatch path mismatch vs reference"

    print("KERNEL_OK")
</pallas_src>

<mosaic_0001>
module attributes {stable_mosaic.version = 11 : i64} {
  func.func @stat_embed_kernel(%arg0: i32, %arg1: i32, %arg2: i32, %arg3: memref<2x8xf32, #tpu.memory_space<vmem>>, %arg4: memref<8x128xf32, #tpu.memory_space<vmem>>, %arg5: memref<1x128xf32, #tpu.memory_space<vmem>>, %arg6: memref<2x128xf32, #tpu.memory_space<vmem>>, %arg7: memref<2x128xf32, #tpu.memory_space<vmem>>) attributes {dimension_semantics = [#tpu.dimension_semantics<parallel>, #tpu.dimension_semantics<parallel>, #tpu.dimension_semantics<arbitrary>], iteration_bounds = array<i64: 1, 1, 1>, scalar_prefetch = 0 : i64, scratch_operands = 1 : i64, tpu.core_type = #tpu.core_type<tc>, window_params = [{transform_indices = @transform_0, window_bounds = array<i64: 2, 8>}, {transform_indices = @transform_1, window_bounds = array<i64: 8, 128>}, {transform_indices = @transform_2, window_bounds = array<i64: 1, 128>}, {transform_indices = @transform_3, window_bounds = array<i64: 2, 128>}]} {
    %c0_i32 = arith.constant 0 : i32
    %0 = arith.cmpi eq, %arg2, %c0_i32 : i32
    %1 = arith.extui %0 : i1 to i32
    %c0_i32_0 = arith.constant 0 : i32
    %2 = arith.cmpi ne, %1, %c0_i32_0 : i32
    scf.if %2 {
      %cst_10 = arith.constant 0.000000e+00 : f32
      %12 = vector.broadcast %cst_10 : f32 to vector<2x128xf32>
      %c0_11 = arith.constant 0 : index
      %c0_12 = arith.constant 0 : index
      %13 = vector.load %arg7[%c0_11, %c0_12] : memref<2x128xf32, #tpu.memory_space<vmem>>, vector<2x128xf32>
      tpu.vector_store %arg7[%c0_11, %c0_12], %12 {strides = array<i32>} : memref<2x128xf32, #tpu.memory_space<vmem>>, vector<2x128xf32>,
    } else {
    }
    %c0 = arith.constant 0 : index
    %c0_1 = arith.constant 0 : index
    %3 = vector.load %arg3[%c0, %c0_1] : memref<2x8xf32, #tpu.memory_space<vmem>>, vector<2x8xf32>
    %c0_2 = arith.constant 0 : index
    %c0_3 = arith.constant 0 : index
    %4 = vector.load %arg4[%c0_2, %c0_3] : memref<8x128xf32, #tpu.memory_space<vmem>>, vector<8x128xf32>
    %c0_4 = arith.constant 0 : index
    %c0_5 = arith.constant 0 : index
    %5 = vector.load %arg7[%c0_4, %c0_5] : memref<2x128xf32, #tpu.memory_space<vmem>>, vector<2x128xf32>
    %cst = arith.constant dense<0.000000e+00> : vector<2x128xf32>
    %6 = tpu.matmul %3, %4, %cst {dimension_numbers = #tpu.dot_dimension_numbers<[1], [0], [0], [1], [0, 0, 1, 1], [], []>} : vector<2x8xf32>, vector<8x128xf32>, vector<2x128xf32> -> vector<2x128xf32>
    %7 = arith.addf %5, %6 : vector<2x128xf32>
    %c0_6 = arith.constant 0 : index
    %c0_7 = arith.constant 0 : index
    %8 = vector.load %arg7[%c0_6, %c0_7] : memref<2x128xf32, #tpu.memory_space<vmem>>, vector<2x128xf32>
    tpu.vector_store %arg7[%c0_6, %c0_7], %7 {strides = array<i32>} : memref<2x128xf32, #tpu.memory_space<vmem>>, vector<2x128xf32>,
    %c0_i32_8 = arith.constant 0 : i32
    %9 = arith.cmpi eq, %arg2, %c0_i32_8 : i32
    %10 = arith.extui %9 : i1 to i32
    %c0_i32_9 = arith.constant 0 : i32
    %11 = arith.cmpi ne, %10, %c0_i32_9 : i32
    scf.if %11 {
      %c0_10 = arith.constant 0 : index
      %c0_11 = arith.constant 0 : index
      %12 = vector.load %arg7[%c0_10, %c0_11] : memref<2x128xf32, #tpu.memory_space<vmem>>, vector<2x128xf32>
      %c0_12 = arith.constant 0 : index
      %c0_13 = arith.constant 0 : index
      %13 = vector.load %arg5[%c0_12, %c0_13] : memref<1x128xf32, #tpu.memory_space<vmem>>, vector<1x128xf32>
      %14 = vector.broadcast %13 : vector<1x128xf32> to vector<2x128xf32>
      %15 = arith.addf %12, %14 : vector<2x128xf32>
      %c0_14 = arith.constant 0 : index
      %c0_15 = arith.constant 0 : index
      %16 = vector.load %arg6[%c0_14, %c0_15] : memref<2x128xf32, #tpu.memory_space<vmem>>, vector<2x128xf32>
      tpu.vector_store %arg6[%c0_14, %c0_15], %15 {strides = array<i32>} : memref<2x128xf32, #tpu.memory_space<vmem>>, vector<2x128xf32>,
    } else {
    }
    return
  }
  func.func @transform_0(%arg0: i32, %arg1: i32, %arg2: i32) -> (i32, i32) {
    %c0_i32 = arith.constant 0 : i32
    return %arg1, %arg2 : i32, i32
  }
  func.func @transform_1(%arg0: i32, %arg1: i32, %arg2: i32) -> (i32, i32) {
    %c0_i32 = arith.constant 0 : i32
    return %arg2, %arg0 : i32, i32
  }
  func.func @transform_2(%arg0: i32, %arg1: i32, %arg2: i32) -> (i32, i32) {
    %c0_i32 = arith.constant 0 : i32
    %c0_i32_0 = arith.constant 0 : i32
    return %c0_i32, %arg0 : i32, i32
  }
  func.func @transform_3(%arg0: i32, %arg1: i32, %arg2: i32) -> (i32, i32) {
    %c0_i32 = arith.constant 0 : i32
    return %arg1, %arg0 : i32, i32
  }
}

</mosaic_0001>

<bundles_post_ra>
// kernel: tpu_custom_call.1
= control target key start
LH: loop header
LB: loop body
LE: loop exit
PB: predicated region body
PF: predicated region fallthrough
CT: control target
= control target key end

     0   :  { %8 = vsyncpa [#allocation4], 0  ;;  %s269_s0 = inlined_call_operand.hbm [shape: f32[2,8], index: 0, kind: input, shape index: {}]   ;;  %s270_s1 = inlined_call_operand.hbm [shape: f32[8,128], index: 1, kind: input, shape index: {}]   ;;  %s271_s2 = inlined_call_operand.vmem [shape: f32[1,128], index: 2, kind: input, shape index: {}]   ;;  %s272_s3 = inlined_call_operand.hbm [shape: f32[2,128], index: 3, kind: output, shape index: {}]  }
   0x1   :  { %9 = vsyncpa [#allocation7], 0 }
   0x2   :  { %10 = vsyncpa [#allocation5], 0  ;;  %s232_s12 = smov [#allocation3]   ;;  %s233_s14 = smov [#allocation6]  }
   0x3   :  { %s17_s13 = sshll.u32 %s232_s12, 4  ;;  %s27_s15 = sshll.u32 %s233_s14, 4  ;;  %s18_s13 = int_to_ptr.vmem [resolvable:$true] %s17_s13  ;;  %s28_s15 = int_to_ptr.vmem [resolvable:$true] %s27_s15 }
   0x4   :  { %s174_s16 = scalar_lea.vmem %s18_s13, 32  ;;  %p179_p1 = scmp.lt.s32.totalorder %s18_s13, %s18_s13 }
   0x5   :  { %p175_p0 = scmp.ne.s32.totalorder %s18_s13, %s174_s16  ;;  %p180_p2 = scmp.lt.s32.totalorder %s174_s16, %s174_s16 }
   0x7   :  { %p181_p3 = por %p180_p2, %p179_p1 }
   0x9   :  { %p182_p4 = pnand %p181_p3, %p175_p0 }
   0xb   :  { %185 = shalt.err (!%p182_p4)
}
   0xc   :  { %20 = dma.hbm_to_vmem [thread:$0]  %s269_s0, 32, %s18_s13, [#allocation4]  }
   0xd   :  { %s194_s19 = scalar_lea.vmem %s28_s15, 128  ;;  %p199_p6 = scmp.lt.s32.totalorder %s28_s15, %s28_s15 }
   0xe   :  { %p195_p5 = scmp.ne.s32.totalorder %s28_s15, %s194_s19  ;;  %p200_p7 = scmp.lt.s32.totalorder %s194_s19, %s194_s19 }
  0x10   :  { %p201_p8 = por %p200_p7, %p199_p6 }
  0x12   :  { %p202_p9 = pnand %p201_p8, %p195_p5 }
  0x14   :  { %205 = shalt.err (!%p202_p9)
}
  0x15   :  { %30 = dma.hbm_to_vmem [thread:$0]  %s270_s1, 128, %s28_s15, [#allocation7]  }
  0x16   :  { %226 = dma.done.wait [#allocation4], 32  }
  0x17   :  { %227 = vsyncadd [#allocation4], 4294967264 }
  0x18   :  { %228 = dma.done.wait [#allocation7], 128  }
  0x19   :  { %229 = vsyncadd [#allocation7], 4294967168  ;;  %v234_v0 = vmov 0.0   ;;  %vm235_vm0 = vmmov 0   ;;  %vm47_vm1 = vcmask 64512   ;;  %v45_v1 = vld [vmem:[#allocation6] sm:$0xff] }
  0x1a   :  { %43 = vst [vmem:[#allocation2] sm:$0x3] %v234_v0  ;;  %156 = vmatprep.subr.mxu0 %v234_v0  ;;  %158 = vmatprep.mubr.msk.f32.mxu0 %vm235_vm0, %v234_v0  ;;  %v44_v2 = vld [vmem:[#allocation3] sm:$0x3]  ;;  %v153_v7 = vld [vmem:[%s271_s2] ss:$0 sm:$0xff] }
  0x1b   :  { %157 = vmatpush3.msra.mxu0 %v45_v1  ;;  %s236_s22 = smov [#allocation8]  }
  0x1c   :  { %159 = vmatmul.mubr.msk.f32.vlgmr.msra.gmra.mxu0 %vm47_vm1, %v44_v2  ;;  %s142_s23 = sshll.u32 %s236_s22, 4  ;;  %s143_s23 = int_to_ptr.vmem [resolvable:$true] %s142_s23 }
  0x1d   :  { %s206_s24 = scalar_lea.vmem %s143_s23, 32  ;;  %p211_p11 = scmp.lt.s32.totalorder %s143_s23, %s143_s23 }
  0x1e   :  { %p207_p10 = scmp.ne.s32.totalorder %s143_s23, %s206_s24  ;;  %p212_p12 = scmp.lt.s32.totalorder %s206_s24, %s206_s24 }
  0x20   :  { %p213_p13 = por %p212_p12, %p211_p11 }
  0x21   :  { %v46_v3 = vld [vmem:[#allocation2] sm:$0x3] }
  0x22   :  { %p214_p0 = pnand %p213_p13, %p207_p10 }
  0xdc   :  { %v117_v4 = vpop.f32.mrf.mxu0 }
  0xdd   :  { %v121_v5 = vadd.f32 %v117_v4, %v46_v3 }
  0xde   :  { %v160_v6 = vpop.f32.mrf.mxu0 }
  0xdf   :  { %122 = vst [vmem:[#allocation2] sm:$0x3] %v121_v5 }
  0xe6   :  { %v126_v8 = vld [vmem:[#allocation2] sm:$0x3] }
  0xe7   :  { %v134_v9 = vadd.f32 %v153_v7, %v126_v8 }
  0xe9   :  { %135 = vst [vmem:[#allocation8] sm:$0x3] %v134_v9 }
  0xea   :  { %217 = shalt.err (!%p214_p0)
}
  0xeb   :  { %145 = dma.vmem_to_hbm [thread:$0]  %s143_s23, 32, %s272_s3, [#allocation5]  }
  0xec   :  { %230 = dma.done.wait [#allocation5], 32  }
  0xed   :  { %231 = vsyncadd [#allocation5], 4294967264 }
  0xee   :  { %149 = vsyncpa [#allocation4], 1 }
  0xef   :  { %150 = vsyncpa [#allocation7], 1 }
  0xf0   :  { %151 = vsyncpa [#allocation5], 1 }

</bundles_post_ra>
